<compile_context>
chip_gen: v5e
topology: v5e:2x2
jax: 0.10.0
libtpu: 0.0.40
codegen_flags: <defaults>
</compile_context>

<pallas_src>
import jax
import jax.numpy as jnp
from jax.experimental import pallas as pl
from jax.experimental.pallas import tpu as pltpu


# --------------------------------------------------------------------------- #
# Kernel
# --------------------------------------------------------------------------- #
def ffpolicy_kernel(x_ref, w1_ref, b1_ref, w2_ref, b2_ref, w3_ref, b3_ref,
                    out_ref):
    two_h = out_ref.shape[-1]
    H = two_h // 2

    x = x_ref[...]

    # Fused layer 1 (actor || critic): [TB, D_in] @ [D_in, 2H]  (one MXU pass)
    h1 = jnp.dot(x, w1_ref[...], preferred_element_type=jnp.float32)
    h1 = jnp.tanh(h1 + b1_ref[...])                       # f32 tanh (EUP)

    # Fused layer 2 (block-diagonal): [TB, 2H] @ [2H, 2H]  (one MXU pass)
    h2 = jnp.dot(h1.astype(w2_ref.dtype), w2_ref[...],
                 preferred_element_type=jnp.float32)
    h2 = jnp.tanh(h2 + b2_ref[...])                       # lanes [:H]=actor, [H:]=critic

    # Critic head (was an N=1 matmul): VPU multiply + XLU lane reduction.
    # w3_ref is [1, 2H] with zeros on the actor half, so no lane-slice is needed.
    value = jnp.sum(h2 * w3_ref[...], axis=-1, keepdims=True) + b3_ref[...]

    # Lane-dense packed store: lanes [:H] = actor features, lanes [H:] = value.
    lane = jax.lax.broadcasted_iota(jnp.int32, h2.shape, 1)
    out_ref[...] = jnp.where(lane < H, h2, value).astype(out_ref.dtype)


# --------------------------------------------------------------------------- #
# Wrapper
# --------------------------------------------------------------------------- #
def pack_params(p, compute_dtype=jnp.float32):
    """Pack actor/critic weights into fused MXU-friendly operands."""
    H = p["a_w2"].shape[1]

    w1 = jnp.concatenate([p["a_w1"], p["v_w1"]], axis=1).astype(compute_dtype)
    b1 = jnp.concatenate([p["a_b1"], p["v_b1"]], axis=1).astype(jnp.float32)

    w2 = jnp.zeros((2 * H, 2 * H), jnp.float32)
    w2 = w2.at[:H, :H].set(p["a_w2"]).at[H:, H:].set(p["v_w2"])
    w2 = w2.astype(compute_dtype)
    b2 = jnp.concatenate([p["a_b2"], p["v_b2"]], axis=1).astype(jnp.float32)

    # v_w3 is [H, 1]; pad the actor half with zeros -> [1, 2H], kept in f32 (VPU).
    w3 = jnp.concatenate(
        [jnp.zeros((1, H), jnp.float32), p["v_w3"].T.astype(jnp.float32)], axis=1)
    b3 = p["v_b3"].reshape(1, 1).astype(jnp.float32)

    return dict(w1=w1, b1=b1, w2=w2, b2=b2, w3=w3, b3=b3)


def ffpolicy_forward(x, packed, *, tile_b=512):
    """x: [B, D_in]. packed: output of pack_params. Returns (value [B,1], actor [B,H])."""
    B, D_in = x.shape
    two_h = packed["w1"].shape[1]
    H = two_h // 2

    # Batch tiling: single tile for small B, 512-row tiles (multiple of 8) otherwise.
    TB = B if B <= tile_b else tile_b
    num_tiles = pl.cdiv(B, TB)
    B_pad = num_tiles * TB
    xp = x if B_pad == B else jnp.pad(x, ((0, B_pad - B), (0, 0)))
    xp = xp.astype(packed["w1"].dtype)

    w1, b1 = packed["w1"], packed["b1"]
    w2, b2 = packed["w2"], packed["b2"]
    w3, b3 = packed["w3"], packed["b3"]

    weight_bytes = sum(v.size * v.dtype.itemsize for v in (w1, b1, w2, b2, w3, b3))
    cost = pl.CostEstimate(
        flops=2 * B_pad * (D_in * two_h + two_h * two_h + two_h),
        transcendentals=2 * B_pad * two_h,
        bytes_accessed=xp.size * xp.dtype.itemsize + weight_bytes
        + B_pad * two_h * 4,
    )

    out = pl.pallas_call(
        ffpolicy_kernel,
        out_shape=jax.ShapeDtypeStruct((B_pad, two_h), jnp.float32),
        grid=(num_tiles,),
        in_specs=[
            pl.BlockSpec((TB, D_in), lambda i: (i, 0)),        # x: batch-tiled
            pl.BlockSpec((D_in, two_h), lambda i: (0, 0)),     # weights: VMEM-resident
            pl.BlockSpec((1, two_h), lambda i: (0, 0)),
            pl.BlockSpec((two_h, two_h), lambda i: (0, 0)),
            pl.BlockSpec((1, two_h), lambda i: (0, 0)),
            pl.BlockSpec((1, two_h), lambda i: (0, 0)),
            pl.BlockSpec((1, 1), lambda i: (0, 0)),
        ],
        out_specs=pl.BlockSpec((TB, two_h), lambda i: (i, 0)),
        compiler_params=pltpu.CompilerParams(
            dimension_semantics=("parallel",)),                # megacore on v7x
        cost_estimate=cost,
    )(xp, w1, b1, w2, b2, w3, b3)

    actor_features = out[:B, :H]
    value = out[:B, H:H + 1]
    return value, actor_features


# --------------------------------------------------------------------------- #
# Parameters / reference
# --------------------------------------------------------------------------- #
def init_params(key, num_inputs, hidden):
    """Deterministic synthetic parameters (nn.Linear shapes, stored [in, out])."""
    ks = jax.random.split(key, 11)

    def lin(kw, kb, fan_in, fan_out):
        bound = 1.0 / jnp.sqrt(fan_in)
        w = jax.random.uniform(kw, (fan_in, fan_out), jnp.float32, -bound, bound)
        b = jax.random.uniform(kb, (1, fan_out), jnp.float32, -bound, bound)
        return w, b

    a_w1, a_b1 = lin(ks[0], ks[1], num_inputs, hidden)
    a_w2, a_b2 = lin(ks[2], ks[3], hidden, hidden)
    v_w1, v_b1 = lin(ks[4], ks[5], num_inputs, hidden)
    v_w2, v_b2 = lin(ks[6], ks[7], hidden, hidden)
    v_w3, v_b3 = lin(ks[8], ks[9], hidden, 1)

    return dict(
        a_w1=a_w1, a_b1=a_b1, a_w2=a_w2, a_b2=a_b2,
        v_w1=v_w1, v_b1=v_b1, v_w2=v_w2, v_b2=v_b2,
        v_w3=v_w3, v_b3=v_b3,
    )


def ffpolicy_forward_ref(x, p):
    """Pure-JAX reference for correctness checking (unfused, f32)."""
    v = jnp.tanh(x @ p["v_w1"] + p["v_b1"])
    v = jnp.tanh(v @ p["v_w2"] + p["v_b2"])
    value = v @ p["v_w3"] + p["v_b3"]
    a = jnp.tanh(x @ p["a_w1"] + p["a_b1"])
    a = jnp.tanh(a @ p["a_w2"] + p["a_b2"])
    return value, a


# --------------------------------------------------------------------------- #
# Test
# --------------------------------------------------------------------------- #
if __name__ == "__main__":
    B, D_IN, H = 8, 32, 64

    key = jax.random.PRNGKey(0)
    k_x, k_p = jax.random.split(key)
    x = jax.random.normal(k_x, (B, D_IN), dtype=jnp.float32)
    params = init_params(k_p, D_IN, H)

    value_ref, actor_ref = ffpolicy_forward_ref(x, params)

    # f32 path (exact match to reference)
    packed_f32 = pack_params(params, jnp.float32)
    value, actor_feat = ffpolicy_forward(x, packed_f32)
    jax.block_until_ready((value, actor_feat))
    assert value.shape == (B, 1) and actor_feat.shape == (B, H)
    assert jnp.allclose(value, value_ref, atol=1e-5, rtol=1e-5)
    assert jnp.allclose(actor_feat, actor_ref, atol=1e-5, rtol=1e-5)

    # bf16-operand path (MXU-native on v6e/v5e; f32 accumulation + f32 elementwise)
    packed_bf16 = pack_params(params, jnp.bfloat16)
    value_b, actor_b = ffpolicy_forward(x, packed_bf16)
    jax.block_until_ready((value_b, actor_b))
    assert jnp.allclose(value_b, value_ref, atol=1e-1, rtol=0)
    assert jnp.allclose(actor_b, actor_ref, atol=1e-1, rtol=0)

    print("KERNEL_OK")
</pallas_src>

<mosaic_0001>
module attributes {stable_mosaic.version = 11 : i64} {
  func.func @ffpolicy_kernel(%arg0: i32, %arg1: memref<8x32xf32, #tpu.memory_space<vmem>>, %arg2: memref<32x128xf32, #tpu.memory_space<vmem>>, %arg3: memref<1x128xf32, #tpu.memory_space<vmem>>, %arg4: memref<128x128xf32, #tpu.memory_space<vmem>>, %arg5: memref<1x128xf32, #tpu.memory_space<vmem>>, %arg6: memref<1x128xf32, #tpu.memory_space<vmem>>, %arg7: memref<1x1xf32, #tpu.memory_space<vmem>>, %arg8: memref<8x128xf32, #tpu.memory_space<vmem>>) attributes {dimension_semantics = [#tpu.dimension_semantics<parallel>], iteration_bounds = array<i64: 1>, scalar_prefetch = 0 : i64, scratch_operands = 0 : i64, tpu.core_type = #tpu.core_type<tc>, window_params = [{transform_indices = @transform_0, window_bounds = array<i64: 8, 32>}, {pipeline_mode = #tpu.pipeline_mode<synchronous>, transform_indices = @transform_1, window_bounds = array<i64: 32, 128>}, {pipeline_mode = #tpu.pipeline_mode<synchronous>, transform_indices = @transform_2, window_bounds = array<i64: 1, 128>}, {pipeline_mode = #tpu.pipeline_mode<synchronous>, transform_indices = @transform_3, window_bounds = array<i64: 128, 128>}, {pipeline_mode = #tpu.pipeline_mode<synchronous>, transform_indices = @transform_4, window_bounds = array<i64: 1, 128>}, {pipeline_mode = #tpu.pipeline_mode<synchronous>, transform_indices = @transform_5, window_bounds = array<i64: 1, 128>}, {pipeline_mode = #tpu.pipeline_mode<synchronous>, transform_indices = @transform_6, window_bounds = array<i64: 1, 1>}, {transform_indices = @transform_7, window_bounds = array<i64: 8, 128>}]} {
    %c0 = arith.constant 0 : index
    %c0_0 = arith.constant 0 : index
    %0 = vector.load %arg1[%c0, %c0_0] : memref<8x32xf32, #tpu.memory_space<vmem>>, vector<8x32xf32>
    %c0_1 = arith.constant 0 : index
    %c0_2 = arith.constant 0 : index
    %1 = vector.load %arg2[%c0_1, %c0_2] : memref<32x128xf32, #tpu.memory_space<vmem>>, vector<32x128xf32>
    %cst = arith.constant dense<0.000000e+00> : vector<8x128xf32>
    %2 = tpu.matmul %0, %1, %cst {dimension_numbers = #tpu.dot_dimension_numbers<[1], [0], [0], [1], [0, 0, 1, 1], [], []>} : vector<8x32xf32>, vector<32x128xf32>, vector<8x128xf32> -> vector<8x128xf32>
    %c0_3 = arith.constant 0 : index
    %c0_4 = arith.constant 0 : index
    %3 = vector.load %arg3[%c0_3, %c0_4] : memref<1x128xf32, #tpu.memory_space<vmem>>, vector<1x128xf32>
    %4 = vector.broadcast %3 : vector<1x128xf32> to vector<8x128xf32>
    %5 = arith.addf %2, %4 : vector<8x128xf32>
    %6 = math.tanh %5 : vector<8x128xf32>
    %c0_5 = arith.constant 0 : index
    %c0_6 = arith.constant 0 : index
    %7 = vector.load %arg4[%c0_5, %c0_6] : memref<128x128xf32, #tpu.memory_space<vmem>>, vector<128x128xf32>
    %cst_7 = arith.constant dense<0.000000e+00> : vector<8x128xf32>
    %8 = tpu.matmul %6, %7, %cst_7 {dimension_numbers = #tpu.dot_dimension_numbers<[1], [0], [0], [1], [0, 0, 1, 1], [], []>} : vector<8x128xf32>, vector<128x128xf32>, vector<8x128xf32> -> vector<8x128xf32>
    %c0_8 = arith.constant 0 : index
    %c0_9 = arith.constant 0 : index
    %9 = vector.load %arg5[%c0_8, %c0_9] : memref<1x128xf32, #tpu.memory_space<vmem>>, vector<1x128xf32>
    %10 = vector.broadcast %9 : vector<1x128xf32> to vector<8x128xf32>
    %11 = arith.addf %8, %10 : vector<8x128xf32>
    %12 = math.tanh %11 : vector<8x128xf32>
    %c0_10 = arith.constant 0 : index
    %c0_11 = arith.constant 0 : index
    %13 = vector.load %arg6[%c0_10, %c0_11] : memref<1x128xf32, #tpu.memory_space<vmem>>, vector<1x128xf32>
    %14 = vector.broadcast %13 : vector<1x128xf32> to vector<8x128xf32>
    %15 = arith.mulf %12, %14 : vector<8x128xf32>
    %cst_12 = arith.constant dense<0.000000e+00> : vector<8xf32>
    %16 = vector.multi_reduction <add>, %15, %cst_12 [1] : vector<8x128xf32> to vector<8xf32>
    %17 = vector.shape_cast %16 : vector<8xf32> to vector<8x1xf32>
    %c0_13 = arith.constant 0 : index
    %c0_14 = arith.constant 0 : index
    %18 = vector.load %arg7[%c0_13, %c0_14] : memref<1x1xf32, #tpu.memory_space<vmem>>, vector<1x1xf32>
    %19 = vector.broadcast %18 : vector<1x1xf32> to vector<8x1xf32>
    %20 = arith.addf %17, %19 : vector<8x1xf32>
    %21 = tpu.iota {dimensions = array<i32: 1>} : vector<8x128xi32>
    %c64_i32 = arith.constant 64 : i32
    %22 = vector.broadcast %c64_i32 : i32 to vector<8x128xi32>
    %23 = arith.cmpi slt, %21, %22 : vector<8x128xi32>
    %24 = vector.shape_cast %20 : vector<8x1xf32> to vector<8x1xf32>
    %25 = vector.broadcast %24 : vector<8x1xf32> to vector<8x128xf32>
    %26 = arith.select %23, %12, %25 : vector<8x128xi1>, vector<8x128xf32>
    %c0_15 = arith.constant 0 : index
    %c0_16 = arith.constant 0 : index
    %27 = vector.load %arg8[%c0_15, %c0_16] : memref<8x128xf32, #tpu.memory_space<vmem>>, vector<8x128xf32>
    tpu.vector_store %arg8[%c0_15, %c0_16], %26 {strides = array<i32>} : memref<8x128xf32, #tpu.memory_space<vmem>>, vector<8x128xf32>,
    return
  }
  func.func @transform_0(%arg0: i32) -> (i32, i32) {
    %c0_i32 = arith.constant 0 : i32
    %c0_i32_0 = arith.constant 0 : i32
    return %arg0, %c0_i32 : i32, i32
  }
  func.func @transform_1(%arg0: i32) -> (i32, i32) {
    %c0_i32 = arith.constant 0 : i32
    %c0_i32_0 = arith.constant 0 : i32
    %c0_i32_1 = arith.constant 0 : i32
    return %c0_i32, %c0_i32_0 : i32, i32
  }
  func.func @transform_2(%arg0: i32) -> (i32, i32) {
    %c0_i32 = arith.constant 0 : i32
    %c0_i32_0 = arith.constant 0 : i32
    %c0_i32_1 = arith.constant 0 : i32
    return %c0_i32, %c0_i32_0 : i32, i32
  }
  func.func @transform_3(%arg0: i32) -> (i32, i32) {
    %c0_i32 = arith.constant 0 : i32
    %c0_i32_0 = arith.constant 0 : i32
    %c0_i32_1 = arith.constant 0 : i32
    return %c0_i32, %c0_i32_0 : i32, i32
  }
  func.func @transform_4(%arg0: i32) -> (i32, i32) {
    %c0_i32 = arith.constant 0 : i32
    %c0_i32_0 = arith.constant 0 : i32
    %c0_i32_1 = arith.constant 0 : i32
    return %c0_i32, %c0_i32_0 : i32, i32
  }
  func.func @transform_5(%arg0: i32) -> (i32, i32) {
    %c0_i32 = arith.constant 0 : i32
    %c0_i32_0 = arith.constant 0 : i32
    %c0_i32_1 = arith.constant 0 : i32
    return %c0_i32, %c0_i32_0 : i32, i32
  }
  func.func @transform_6(%arg0: i32) -> (i32, i32) {
    %c0_i32 = arith.constant 0 : i32
    %c0_i32_0 = arith.constant 0 : i32
    %c0_i32_1 = arith.constant 0 : i32
    return %c0_i32, %c0_i32_0 : i32, i32
  }
  func.func @transform_7(%arg0: i32) -> (i32, i32) {
    %c0_i32 = arith.constant 0 : i32
    %c0_i32_0 = arith.constant 0 : i32
    return %arg0, %c0_i32 : i32, i32
  }
}

</mosaic_0001>

<bundles_post_ra>
// kernel: tpu_custom_call.1
= control target key start
LH: loop header
LB: loop body
LE: loop exit
PB: predicated region body
PF: predicated region fallthrough
CT: control target
= control target key end

     0   :  { %s379_s0 = inlined_call_operand.hbm [shape: f32[8,32], index: 0, kind: input, shape index: {}]   ;;  %s380_s1 = inlined_call_operand.hbm [shape: f32[32,128], index: 1, kind: input, shape index: {}]   ;;  %s381_s2 = inlined_call_operand.vmem [shape: f32[1,128], index: 2, kind: input, shape index: {}]   ;;  %s382_s3 = inlined_call_operand.hbm [shape: f32[128,128], index: 3, kind: input, shape index: {}]   ;;  %s383_s4 = inlined_call_operand.vmem [shape: f32[1,128], index: 4, kind: input, shape index: {}]   ;;  %s384_s5 = inlined_call_operand.vmem [shape: f32[1,128], index: 5, kind: input, shape index: {}]   ;;  %s385_s6 = inlined_call_operand.<no memory space> [shape: f32[1,1], index: 6, kind: input, shape index: {}]   ;;  %s386_s7 = inlined_call_operand.hbm [shape: f32[8,128], index: 7, kind: output, shape index: {}]  }
   0x1   :  { %v12_v0 = vstv %s385_s6 }
   0x2   :  { %13 = vst [vmem:[#allocation2] sm:$0x1] %v12_v0 }
   0x3   :  { %14 = vsyncpa [#allocation4], 0 }
   0x4   :  { %15 = vsyncpa [#allocation7], 0  ;;  %s32_s28 = sshll.u32 %s380_s1, 4  ;;  %s33_s28 = int_to_ptr.hbm [resolvable:$true] %s32_s28 }
   0x5   :  { %16 = vsyncpa [#allocation5], 0  ;;  %s308_s29 = smov [#allocation6]   ;;  %s22_s10 = sshll.u32 %s379_s0, 4  ;;  %s23_s10 = int_to_ptr.hbm [resolvable:$true] %s22_s10 }
   0x6   :  { %s34_s30 = sshll.u32 %s308_s29, 4  ;;  %s309_s11 = smov 128   ;;  %s35_s30 = int_to_ptr.vmem [resolvable:$true] %s34_s30 }
   0x7   :  { %s310_s12 = smov 8   ;;  %s311_s6 = smov [#allocation3]  }
   0x8   :  { %40 = dma.hbm_to_vmem [thread:$0]  %s33_s28, 512, %s35_s30, [#allocation7], %s309_s11, %s309_s11, %s310_s12  }
   0x9   :  { %s24_s13 = sshll.u32 %s311_s6, 4  ;;  %s47_s16 = sshll.u32 %s382_s3, 4  ;;  %s25_s13 = int_to_ptr.vmem [resolvable:$true] %s24_s13  ;;  %s48_s16 = int_to_ptr.hbm [resolvable:$true] %s47_s16 }
   0xa   :  { %27 = dma.hbm_to_vmem [thread:$0]  %s23_s10, 128, %s25_s13, [#allocation4]  }
   0xb   :  { %s312_s1 = smov [#allocation8]  }
   0xc   :  { %s49_s17 = sshll.u32 %s312_s1, 4  ;;  %s50_s17 = int_to_ptr.vmem [resolvable:$true] %s49_s17 }
   0xd   :  { %55 = dma.hbm_to_vmem [thread:$0]  %s48_s16, 2048, %s50_s17, [#allocation7], %s309_s11, %s309_s11, %s310_s12  }
   0xe   :  { %302 = dma.done.wait [#allocation4], 128  }
   0xf   :  { %303 = vsyncadd [#allocation4], 4294967168 }
  0x10   :  { %304 = dma.done.wait [#allocation7], 2560  }
  0x11   :  { %305 = vsyncadd [#allocation7], 4294964736  ;;  %v78_v1 = vld [vmem:[#allocation6 + $0x18] sm:$0xff]  ;;  %v77_v2 = vld [vmem:[#allocation6 + $0x10] sm:$0xff]  ;;  %vm83_vm0 = vcmask 261120   ;;  %v313_v32 = vmov 0   ;;  %v161_v36 = vlaneseq }
  0x12   :  { %99 = vmatpush.msra.mxu0 %v78_v1  ;;  %v123_v3 = vld [vmem:[#allocation8 + $0x78] sm:$0xff]  ;;  %v76_v4 = vld [vmem:[#allocation6 + $0x8] sm:$0xff]  ;;  %v122_v5 = vld [vmem:[#allocation8 + $0x70] sm:$0xff]  ;;  %197 = vset.pattern.permute.xlu0 %v313_v32  ;;  %s178_s24 = sshll.u32 %s386_s7, 4  ;;  %s179_s24 = int_to_ptr.hbm [resolvable:$true] %s178_s24 }
  0x13   :  { %128 = vmatpush.msra.mxu1 %v123_v3  ;;  %v121_v6 = vld [vmem:[#allocation8 + $0x68] sm:$0xff]  ;;  %v75_v7 = vld [vmem:[#allocation6] sm:$0xff]  ;;  %v74_v8 = vld [vmem:[#allocation3] sm:$0xff]  ;;  %v162_v37 = vand.u32 127, %v161_v36 }
  0x14   :  { %100 = vmatpush.msra.mxu0 %v77_v2  ;;  %v120_v9 = vld [vmem:[#allocation8 + $0x60] sm:$0xff]  ;;  %v119_v10 = vld [vmem:[#allocation8 + $0x58] sm:$0xff]  ;;  %v118_v11 = vld [vmem:[#allocation8 + $0x50] sm:$0xff] }
  0x15   :  { %129 = vmatpush.msra.mxu1 %v122_v5  ;;  %v117_v12 = vld [vmem:[#allocation8 + $0x48] sm:$0xff]  ;;  %v116_v13 = vld [vmem:[#allocation8 + $0x40] sm:$0xff]  ;;  %v115_v14 = vld [vmem:[#allocation8 + $0x38] sm:$0xff]  ;;  %vm163_vm1 = vcmp.lt.s32.totalorder %v162_v37, 64 }
  0x16   :  { %101 = vmatpush.msra.mxu0 %v76_v4  ;;  %v114_v15 = vld [vmem:[#allocation8 + $0x30] sm:$0xff]  ;;  %v113_v16 = vld [vmem:[#allocation8 + $0x28] sm:$0xff]  ;;  %v112_v17 = vld [vmem:[#allocation8 + $0x20] sm:$0xff] }
  0x17   :  { %130 = vmatpush.msra.mxu1 %v121_v6  ;;  %v111_v18 = vld [vmem:[#allocation8 + $0x18] sm:$0xff]  ;;  %v110_v19 = vld [vmem:[#allocation8 + $0x10] sm:$0xff]  ;;  %v109_v20 = vld [vmem:[#allocation8 + $0x8] sm:$0xff] }
  0x18   :  { %102 = vmatpush.msra.mxu0 %v75_v7  ;;  %v108_v21 = vld [vmem:[#allocation8] sm:$0xff]  ;;  %v198_v22 = vld [vmem:[%s381_s2] ss:$0 sm:$0xff]  ;;  %s314_s2 = smov [#allocation9]  }
  0x19   :  { %189 = vmatmul.msk.f32.vlgmr.msra.gmra.mxu0 %vm83_vm0, %v74_v8  ;;  %131 = vmatpush.msra.mxu1 %v120_v9  ;;  %v199_v26 = vld [vmem:[%s383_s4] ss:$0 sm:$0xff]  ;;  %s176_s4 = sshll.u32 %s314_s2, 4  ;;  %s177_s4 = int_to_ptr.vmem [resolvable:$true] %s176_s4 }
  0x1a   :  { %v200_v29 = vld [vmem:[%s384_s5] ss:$0 sm:$0xff] }
  0x1b   :  { %132 = vmatpush.msra.mxu1 %v119_v10  ;;  %v201_v33 = vld [vmem:[#allocation2] ss:$0 sm:$0xff] }
  0x1d   :  { %133 = vmatpush.msra.mxu1 %v118_v11 }
  0x1f   :  { %134 = vmatpush.msra.mxu1 %v117_v12 }
  0x21   :  { %135 = vmatpush.msra.mxu1 %v116_v13 }
  0x23   :  { %136 = vmatpush.msra.mxu1 %v115_v14 }
  0x25   :  { %137 = vmatpush.msra.mxu1 %v114_v15 }
  0x27   :  { %138 = vmatpush.msra.mxu1 %v113_v16 }
  0x29   :  { %139 = vmatpush.msra.mxu1 %v112_v17 }
  0x2b   :  { %140 = vmatpush.msra.mxu1 %v111_v18 }
  0x2d   :  { %141 = vmatpush.msra.mxu1 %v110_v19 }
  0x2f   :  { %142 = vmatpush.msra.mxu1 %v109_v20 }
  0x31   :  { %143 = vmatpush.msra.mxu1 %v108_v21 }
  0x96   :  { %v104_v23 = vpop.f32.mrf.mxu0 }
  0x97   :  { %v105_v24 = vadd.f32 %v198_v22, %v104_v23 }
  0x99   :  { %202 = vtanh.f32 %v105_v24 }
  0x9f   :  { %v203_v25 = vpop.eup %202 }
  0xa0   :  { %144 = vmatmul.f32.vlgmr.msra.gmra.mxu1 %v203_v25 }
 0x11d   :  { %v145_v27 = vpop.f32.mrf.mxu1 }
 0x11e   :  { %v146_v28 = vadd.f32 %v199_v26, %v145_v27 }
 0x120   :  { %204 = vtanh.f32 %v146_v28 }
 0x126   :  { %v205_v30 = vpop.eup %204 }
 0x127   :  { %v153_v31 = vmul.f32 %v205_v30, %v200_v29 }
 0x129   :  { %154 = vadd.xlane.f32.xlu0 %v153_v31 }
 0x19c   :  { %v155_v34 = vpop.xlane.xlu0 %154 }
 0x19d   :  { %v160_v35 = vadd.f32 %v201_v33, %v155_v34 }
 0x19f   :  { %166 = vperm.xlu0 %197, %v160_v35  }
 0x211   :  { %v167_v38 = vpop.permute.xlu0 %166 }
 0x212   :  { %v169_v39 = vsel %vm163_vm1, %v205_v30, %v167_v38 }
 0x213   :  { %170 = vst [vmem:[#allocation9] sm:$0xff] %v169_v39 }
 0x214   :  { %181 = dma.vmem_to_hbm [thread:$0]  %s177_s4, 128, %s179_s24, [#allocation5]  }
 0x215   :  { %306 = dma.done.wait [#allocation5], 128  }
 0x216   :  { %307 = vsyncadd [#allocation5], 4294967168 }
 0x217   :  { %186 = vsyncpa [#allocation4], 1 }
 0x218   :  { %187 = vsyncpa [#allocation7], 1 }
 0x219   :  { %188 = vsyncpa [#allocation5], 1 }

</bundles_post_ra>
